<compile_context>
chip_gen: v6e
topology: v6e:2x2x1
jax: 0.10.0
libtpu: 0.0.40
codegen_flags: <defaults>
</compile_context>

<pallas_src>
import math
import functools

import jax
import jax.numpy as jnp
from jax.experimental import pallas as pl
from jax.experimental.pallas import tpu as pltpu


# ---------------------------------------------------------------------------
# Parameter / buffer setup (plain JAX glue, deterministic)
# ---------------------------------------------------------------------------
def make_positional_encoding(d_model: int, max_len: int = 5000) -> jnp.ndarray:
    """Replicates the PyTorch buffer `pe` of shape [max_len, 1, d_model]."""
    position = jnp.arange(max_len, dtype=jnp.float32)[:, None]          # [max_len, 1]
    div_term = jnp.exp(
        jnp.arange(0, d_model, 2, dtype=jnp.float32)
        * (-math.log(10000.0) / d_model)
    )                                                                    # [d_model/2]
    pe = jnp.zeros((max_len, d_model), dtype=jnp.float32)
    pe = pe.at[:, 0::2].set(jnp.sin(position * div_term))
    pe = pe.at[:, 1::2].set(jnp.cos(position * div_term))
    return pe[:, None, :]                                                # [max_len, 1, d_model]


# ---------------------------------------------------------------------------
# Pallas kernels
# ---------------------------------------------------------------------------
def _pe_add_kernel(x_ref, pe_ref, o_ref):
    # x_ref: (TS, B, D) tile, pe_ref: (TS, 1, D) tile -> broadcast add over batch.
    o_ref[...] = (x_ref[...] + pe_ref[...]).astype(o_ref.dtype)


def _pe_add_dropout_kernel(x_ref, pe_ref, bits_ref, o_ref, *, thr: int, scale: float):
    # Training-mode dropout: keep with prob (1-p) via integer threshold on raw
    # uint32 bits, fold the 1/(1-p) scale into a single select.
    y = x_ref[...] + pe_ref[...]
    keep = bits_ref[...] >= jnp.uint32(thr)
    o_ref[...] = jnp.where(keep, y * scale, 0.0).astype(o_ref.dtype)


# ---------------------------------------------------------------------------
# Tiling helper
# ---------------------------------------------------------------------------
def _choose_seq_tile(S: int, B: int, D: int, itemsize: int, training: bool,
                     vmem_budget_bytes: int = 16 * 1024 * 1024) -> int:
    """Biggest seq tile whose double-buffered footprint stays under the budget.

    Budget is conservative (<=16 MiB resident) so the same tile works on
    v5e (16 MiB scoped default), v6e and v7x (64 MiB physical VMEM).
    """
    row = 2 * B * D * itemsize          # x block + out block
    row += D * itemsize                 # pe block (broadcast over batch)
    if training:
        row += B * D * 4                # uint32 random bits block
    ts = vmem_budget_bytes // (2 * row)  # x2 for double buffering
    ts = max(8, (ts // 8) * 8)           # keep it sublane-friendly
    return min(S, ts)


# ---------------------------------------------------------------------------
# Wrapper
# ---------------------------------------------------------------------------
def positional_encoding_forward(x, pe, *, dropout_p: float = 0.1,
                                training: bool = False, rng_key=None):
    """x: [seq_len, batch, d_model]; pe: [max_len, 1, d_model] (float32 buffer)."""
    S, B, D = x.shape
    pe_sliced = pe[:S].astype(x.dtype)           # keep pe traffic at 1/B of x traffic
    do_dropout = training and float(dropout_p) > 0.0

    TS = _choose_seq_tile(S, B, D, x.dtype.itemsize, do_dropout)
    grid = (pl.cdiv(S, TS),)

    x_spec = pl.BlockSpec((TS, B, D), lambda i: (i, 0, 0))
    pe_spec = pl.BlockSpec((TS, 1, D), lambda i: (i, 0, 0))
    out_spec = pl.BlockSpec((TS, B, D), lambda i: (i, 0, 0))
    out_shape = jax.ShapeDtypeStruct((S, B, D), x.dtype)
    cparams = pltpu.CompilerParams(
        dimension_semantics=("parallel",),       # shard seq tiles across TCs on v7x
        vmem_limit_bytes=32 * 1024 * 1024,
    )

    if not do_dropout:
        # Eval mode: dropout is identity -> plain broadcast add, seq-tiled.
        return pl.pallas_call(
            _pe_add_kernel,
            out_shape=out_shape,
            grid=grid,
            in_specs=[x_spec, pe_spec],
            out_specs=out_spec,
            compiler_params=cparams,
        )(x, pe_sliced)

    # Training mode: random bits from jax.random (deterministic, portable);
    # mask + scale fused in-kernel.
    if rng_key is None:
        rng_key = jax.random.PRNGKey(0)
    bits = jax.random.bits(rng_key, (S, B, D), dtype=jnp.uint32)
    thr = min(int(round(float(dropout_p) * (2 ** 32))), 2 ** 32 - 1)
    scale = 1.0 / (1.0 - float(dropout_p))
    kernel = functools.partial(_pe_add_dropout_kernel, thr=thr, scale=scale)
    return pl.pallas_call(
        kernel,
        out_shape=out_shape,
        grid=grid,
        in_specs=[x_spec, pe_spec, x_spec],      # bits share x's tiling
        out_specs=out_spec,
        compiler_params=cparams,
    )(x, pe_sliced, bits)


# ---------------------------------------------------------------------------
# Demo / correctness check
# ---------------------------------------------------------------------------
if __name__ == "__main__":
    seq_len, batch, d_model = 8, 2, 128       # lane-dense last dim (multiple of 128)
    max_len = 64                              # small max_len for the demo

    key = jax.random.PRNGKey(0)
    kx, kd = jax.random.split(key)
    x = jax.random.normal(kx, (seq_len, batch, d_model), dtype=jnp.float32)

    pe = make_positional_encoding(d_model, max_len)

    # Eval mode (dropout = identity) — deterministic check against reference.
    out = positional_encoding_forward(x, pe, dropout_p=0.1, training=False)
    out = jax.block_until_ready(out)
    ref = x + pe[:seq_len].astype(x.dtype)
    assert out.shape == (seq_len, batch, d_model)
    assert jnp.allclose(out, ref, atol=1e-6), "eval-mode mismatch vs reference"

    # Training mode (in-kernel masked add) — check against an identical-mask reference.
    p = 0.1
    out_train = positional_encoding_forward(x, pe, dropout_p=p, training=True,
                                            rng_key=kd)
    out_train = jax.block_until_ready(out_train)
    bits_ref = jax.random.bits(kd, (seq_len, batch, d_model), dtype=jnp.uint32)
    thr_ref = jnp.uint32(min(int(round(p * (2 ** 32))), 2 ** 32 - 1))
    ref_train = jnp.where(bits_ref >= thr_ref,
                          (x + pe[:seq_len]) * (1.0 / (1.0 - p)),
                          0.0).astype(x.dtype)
    assert out_train.shape == (seq_len, batch, d_model)
    assert jnp.allclose(out_train, ref_train, atol=1e-5), "train-mode mismatch vs reference"

    print("KERNEL_OK")
</pallas_src>

<mosaic_0001>
module attributes {stable_mosaic.version = 11 : i64} {
  func.func @_pe_add_kernel(%arg0: i32, %arg1: memref<8x2x128xf32, #tpu.memory_space<vmem>>, %arg2: memref<8x1x128xf32, #tpu.memory_space<vmem>>, %arg3: memref<8x2x128xf32, #tpu.memory_space<vmem>>) attributes {dimension_semantics = [#tpu.dimension_semantics<parallel>], iteration_bounds = array<i64: 1>, scalar_prefetch = 0 : i64, scratch_operands = 0 : i64, tpu.core_type = #tpu.core_type<tc>, window_params = [{transform_indices = @transform_0, window_bounds = array<i64: 8, 2, 128>}, {transform_indices = @transform_1, window_bounds = array<i64: 8, 1, 128>}, {transform_indices = @transform_2, window_bounds = array<i64: 8, 2, 128>}]} {
    %c0 = arith.constant 0 : index
    %c0_0 = arith.constant 0 : index
    %c0_1 = arith.constant 0 : index
    %0 = vector.load %arg1[%c0, %c0_0, %c0_1] : memref<8x2x128xf32, #tpu.memory_space<vmem>>, vector<8x2x128xf32>
    %c0_2 = arith.constant 0 : index
    %c0_3 = arith.constant 0 : index
    %c0_4 = arith.constant 0 : index
    %1 = vector.load %arg2[%c0_2, %c0_3, %c0_4] : memref<8x1x128xf32, #tpu.memory_space<vmem>>, vector<8x1x128xf32>
    %2 = vector.broadcast %1 : vector<8x1x128xf32> to vector<8x2x128xf32>
    %3 = arith.addf %0, %2 : vector<8x2x128xf32>
    %c0_5 = arith.constant 0 : index
    %c0_6 = arith.constant 0 : index
    %c0_7 = arith.constant 0 : index
    %4 = vector.load %arg3[%c0_5, %c0_6, %c0_7] : memref<8x2x128xf32, #tpu.memory_space<vmem>>, vector<8x2x128xf32>
    tpu.vector_store %arg3[%c0_5, %c0_6, %c0_7], %3 {strides = array<i32>} : memref<8x2x128xf32, #tpu.memory_space<vmem>>, vector<8x2x128xf32>,
    return
  }
  func.func @transform_0(%arg0: i32) -> (i32, i32, i32) {
    %c0_i32 = arith.constant 0 : i32
    %c0_i32_0 = arith.constant 0 : i32
    %c0_i32_1 = arith.constant 0 : i32
    return %arg0, %c0_i32, %c0_i32_0 : i32, i32, i32
  }
  func.func @transform_1(%arg0: i32) -> (i32, i32, i32) {
    %c0_i32 = arith.constant 0 : i32
    %c0_i32_0 = arith.constant 0 : i32
    %c0_i32_1 = arith.constant 0 : i32
    return %arg0, %c0_i32, %c0_i32_0 : i32, i32, i32
  }
  func.func @transform_2(%arg0: i32) -> (i32, i32, i32) {
    %c0_i32 = arith.constant 0 : i32
    %c0_i32_0 = arith.constant 0 : i32
    %c0_i32_1 = arith.constant 0 : i32
    return %arg0, %c0_i32, %c0_i32_0 : i32, i32, i32
  }
}

</mosaic_0001>

<bundles_post_ra>
// kernel: tpu_custom_call.1
= control target key start
LH: loop header
LB: loop body
LE: loop exit
PB: predicated region body
PF: predicated region fallthrough
CT: control target
= control target key end

     0   :  { %7 = vsyncpa [#allocation3], 0  ;;  %s259_s0 = inlined_call_operand.hbm [shape: f32[8,2,128], index: 0, kind: input, shape index: {}]   ;;  %s260_s1 = inlined_call_operand.hbm [shape: f32[8,1,128], index: 1, kind: input, shape index: {}]   ;;  %s261_s2 = inlined_call_operand.hbm [shape: f32[8,2,128], index: 2, kind: output, shape index: {}]  }
   0x1   :  { %8 = vsyncpa [#allocation6], 0 }
   0x2   :  { %9 = vsyncpa [#allocation4], 0  ;;  %s219_s9 = smov [#allocation2]  }
   0x3   :  { %s15_s10 = sshll.u32 %s219_s9, 4  ;;  %s16_s10 = int_to_ptr.vmem [resolvable:$true] %s15_s10 }
   0x4   :  { %s161_s11 = scalar_lea.vmem %s16_s10, 256  ;;  %p166_p1 = scmp.lt.s32.totalorder %s16_s10, %s16_s10 }
   0x5   :  { %p162_p0 = scmp.ne.s32.totalorder %s16_s10, %s161_s11  ;;  %p167_p2 = scmp.lt.s32.totalorder %s161_s11, %s161_s11 }
   0x7   :  { %p168_p3 = por %p167_p2, %p166_p1 }
   0x9   :  { %p169_p4 = pnand %p168_p3, %p162_p0 }
   0xb   :  { %172 = shalt.err (!%p169_p4)
}
   0xc   :  { %s220_s12 = smov 32   ;;  %s221_s13 = smov 2  }
   0xd   :  { %21 = dma.hbm_to_vmem [thread:$0]  %s259_s0, 256, %s16_s10, [#allocation3], %s220_s12, %s220_s12, %s221_s13  }
   0xe   :  { %s222_s16 = smov [#allocation5]  }
   0xf   :  { %s27_s17 = sshll.u32 %s222_s16, 4  ;;  %s28_s17 = int_to_ptr.vmem [resolvable:$true] %s27_s17 }
  0x10   :  { %s181_s18 = scalar_lea.vmem %s28_s17, 128  ;;  %p186_p6 = scmp.lt.s32.totalorder %s28_s17, %s28_s17 }
  0x11   :  { %p182_p5 = scmp.ne.s32.totalorder %s28_s17, %s181_s18  ;;  %p187_p7 = scmp.lt.s32.totalorder %s181_s18, %s181_s18 }
  0x13   :  { %p188_p8 = por %p187_p7, %p186_p6 }
  0x15   :  { %p189_p9 = pnand %p188_p8, %p182_p5 }
  0x17   :  { %192 = shalt.err (!%p189_p9)
}
  0x18   :  { %s223_s19 = smov 16   ;;  %s224_s20 = smov 1  }
  0x19   :  { %33 = dma.hbm_to_vmem [thread:$0]  %s260_s1, 128, %s28_s17, [#allocation6], %s223_s19, %s223_s19, %s224_s20  }
  0x1a   :  { %213 = dma.done.wait [#allocation3], 256  }
  0x1b   :  { %214 = vsyncadd [#allocation3], 4294967040 }
  0x1c   :  { %215 = dma.done.wait [#allocation6], 128  }
  0x1d   :  { %216 = vsyncadd [#allocation6], 4294967168  ;;  %s225_s0 = smov [#allocation7]   ;;  %v40_v0 = vld [vmem:[#allocation2] sm:$0x3] }
  0x1e   :  { %s250_s23 = sshll.u32 %s225_s0, 4  ;;  %v138_v1 = vld [vmem:[#allocation5] ss:$0 sm:$0xff]  ;;  %v41_v2 = vld [vmem:[#allocation2 + $0x2] sm:$0x3]  ;;  %s126_s23 = int_to_ptr.vmem [resolvable:$true] %s250_s23 }
  0x1f   :  { %v104_v3 = vadd.f32 %v138_v1, %v40_v0  ;;  %v139_v4 = vld [vmem:[#allocation5 + $0x1] ss:$0 sm:$0xff]  ;;  %v42_v5 = vld [vmem:[#allocation2 + $0x4] sm:$0x3]  ;;  %v140_v6 = vld [vmem:[#allocation5 + $0x2] ss:$0 sm:$0xff]  ;;  %p198_p11 = scmp.lt.s32.totalorder %s126_s23, %s126_s23 }
  0x20   :  { %v105_v7 = vadd.f32 %v139_v4, %v41_v2  ;;  %v106_v8 = vadd.f32 %v140_v6, %v42_v5  ;;  %v43_v9 = vld [vmem:[#allocation2 + $0x6] sm:$0x3]  ;;  %v141_v10 = vld [vmem:[#allocation5 + $0x3] ss:$0 sm:$0xff]  ;;  %v44_v11 = vld [vmem:[#allocation2 + $0x8] sm:$0x3] }
  0x21   :  { %112 = vst [vmem:[#allocation7] sm:$0x3] %v104_v3  ;;  %v107_v12 = vadd.f32 %v141_v10, %v43_v9  ;;  %v142_v13 = vld [vmem:[#allocation5 + $0x4] ss:$0 sm:$0xff]  ;;  %v45_v14 = vld [vmem:[#allocation2 + $0xa] sm:$0x3] }
  0x22   :  { %v143_v15 = vld [vmem:[#allocation5 + $0x5] ss:$0 sm:$0xff]  ;;  %113 = vst [vmem:[#allocation7 + $0x2] sm:$0x3] %v105_v7  ;;  %114 = vst [vmem:[#allocation7 + $0x4] sm:$0x3] %v106_v8  ;;  %v108_v16 = vadd.f32 %v142_v13, %v44_v11 }
  0x23   :  { %v109_v17 = vadd.f32 %v143_v15, %v45_v14  ;;  %v46_v18 = vld [vmem:[#allocation2 + $0xc] sm:$0x3]  ;;  %v144_v19 = vld [vmem:[#allocation5 + $0x6] ss:$0 sm:$0xff]  ;;  %v47_v20 = vld [vmem:[#allocation2 + $0xe] sm:$0x3] }
  0x24   :  { %115 = vst [vmem:[#allocation7 + $0x6] sm:$0x3] %v107_v12  ;;  %v110_v21 = vadd.f32 %v144_v19, %v46_v18  ;;  %v145_v22 = vld [vmem:[#allocation5 + $0x7] ss:$0 sm:$0xff]  ;;  %116 = vst [vmem:[#allocation7 + $0x8] sm:$0x3] %v108_v16 }
  0x25   :  { %117 = vst [vmem:[#allocation7 + $0xa] sm:$0x3] %v109_v17  ;;  %v111_v23 = vadd.f32 %v145_v22, %v47_v20  ;;  %s193_s1 = scalar_lea.vmem %s126_s23, 256 }
  0x26   :  { %118 = vst [vmem:[#allocation7 + $0xc] sm:$0x3] %v110_v21  ;;  %p194_p10 = scmp.ne.s32.totalorder %s126_s23, %s193_s1  ;;  %p199_p12 = scmp.lt.s32.totalorder %s193_s1, %s193_s1 }
  0x27   :  { %119 = vst [vmem:[#allocation7 + $0xe] sm:$0x3] %v111_v23 }
  0x28   :  { %p200_p13 = por %p199_p12, %p198_p11 }
  0x2a   :  { %p201_p0 = pnand %p200_p13, %p194_p10 }
  0x2c   :  { %204 = shalt.err (!%p201_p0)
}
  0x2d   :  { %131 = dma.vmem_to_hbm [thread:$0]  %s126_s23, 256, %s261_s2, [#allocation4], %s220_s12, %s220_s12, %s221_s13  }
  0x2e   :  { %217 = dma.done.wait [#allocation4], 256  }
  0x2f   :  { %218 = vsyncadd [#allocation4], 4294967040 }
  0x30   :  { %135 = vsyncpa [#allocation3], 1 }
  0x31   :  { %136 = vsyncpa [#allocation6], 1 }
  0x32   :  { %137 = vsyncpa [#allocation4], 1 }

</bundles_post_ra>
